<compile_context>
chip_gen: v7x
topology: tpu7x:2x2x1
jax: 0.10.0
libtpu: 0.0.40
codegen_flags: <defaults>
</compile_context>

<pallas_src>
import functools
import math

import jax
import jax.numpy as jnp
from jax import lax
from jax.experimental import pallas as pl
from jax.experimental.pallas import tpu as pltpu


# Large finite negative: exp(mask - row_max) underflows to exactly 0 in f32,
# matching torch's -inf masking without NaN risk for fully-masked rows.
_MASK_VALUE = -1e30


def _self_attn_kernel(x_q_ref, x_kv_ref, w_q_ref, w_kv_ref, o_ref, *,
                      heads, mask_mode):
    # x_q_ref:  (tq, k) bf16 -- query rows handled by this grid step
    # x_kv_ref: (t,  k) bf16 -- all rows (keys / values)
    # w_q_ref:  (k, k)  bf16 -- Wq.T (1/sqrt(k) pre-folded unless mask_mode)
    # w_kv_ref: (k, 2k) bf16 -- [Wk.T | Wv.T]
    # o_ref:    (tq, k)      -- head h occupies columns [h*s, (h+1)*s)
    tq, k = x_q_ref.shape
    t_kv = x_kv_ref.shape[0]
    s = k // heads

    # Projections: bf16 operands, f32 accumulation on the MXU.
    q = jnp.dot(x_q_ref[...], w_q_ref[...],
                preferred_element_type=jnp.float32)          # (tq, k)
    kv = jnp.dot(x_kv_ref[...], w_kv_ref[...],
                 preferred_element_type=jnp.float32)         # (t_kv, 2k)

    # Head-batched (heads, t, s) layout; bf16 operands for attention matmuls.
    q_h = q.astype(jnp.bfloat16).reshape(tq, heads, s).transpose(1, 0, 2)
    k_h = kv[:, :k].astype(jnp.bfloat16).reshape(t_kv, heads, s).transpose(1, 0, 2)
    v_h = kv[:, k:].astype(jnp.bfloat16).reshape(t_kv, heads, s).transpose(1, 0, 2)

    # Scores for all heads in one batched MXU pass: (heads, tq, t_kv), f32.
    scores = jnp.einsum("hqd,hkd->hqk", q_h, k_h,
                        preferred_element_type=jnp.float32)

    if mask_mode:
        # Matches the torch module: no 1/sqrt(k) scaling in mask mode;
        # strictly upper-triangular (global row index) entries masked.
        row = lax.broadcasted_iota(jnp.int32, (tq, t_kv), 0) + pl.program_id(1) * tq
        col = lax.broadcasted_iota(jnp.int32, (tq, t_kv), 1)
        scores = jnp.where((col > row)[None, :, :], _MASK_VALUE, scores)

    # Row softmax in f32 (denominator reciprocal on the EUP slot).
    m = jnp.max(scores, axis=-1, keepdims=True)
    p = jnp.exp(scores - m)
    denom = jnp.sum(p, axis=-1, keepdims=True)
    p = p * pl.reciprocal(denom, approx=True)

    # P @ V, batched over heads: (heads, tq, s), bf16 operands / f32 acc.
    out_h = jnp.einsum("hqk,hkd->hqd", p.astype(jnp.bfloat16), v_h,
                       preferred_element_type=jnp.float32)

    # Single lane-dense (tq, k) store; head h -> columns [h*s, (h+1)*s).
    o_ref[...] = out_h.transpose(1, 0, 2).reshape(tq, k).astype(o_ref.dtype)


def self_attention(x, wq, wk, wv, heads=4, mask_mode=False):
    """x: (b, t, k); wq/wk/wv: PyTorch Linear weights, shape (k, k) = (out, in)."""
    b, t, k = x.shape
    assert k % heads == 0
    s = k // heads

    # q-tile: full t for short sequences, otherwise 256-row tiles (sublane
    # multiple; bounds the (heads, tq, t) scores and feeds both v7x TCs).
    q_tile = t if t <= 256 else 256
    assert t % q_tile == 0  # TODO(synk): pad / handle ragged t not a multiple of the tile.
    n_q = t // q_tile

    # PyTorch Linear computes y = x @ W.T. Fold 1/sqrt(k) into Wq (weight side,
    # computed once); fuse K and V into one (k, 2k) weight; cast to bf16.
    scale = 1.0 if mask_mode else 1.0 / math.sqrt(k)
    w_q = jnp.asarray(wq.T * scale, dtype=jnp.bfloat16)                   # (k, k)
    w_kv = jnp.concatenate([wk.T, wv.T], axis=1).astype(jnp.bfloat16)     # (k, 2k)
    x_bf = x.astype(jnp.bfloat16)

    # Explicit VMEM budget: double-buffered tiles + in-kernel intermediates,
    # with ~2x headroom, clamped well under physical VMEM.
    out_bytes = jnp.dtype(x.dtype).itemsize
    tiles = 2 * (q_tile * k * 2 + t * k * 2 + k * k * 2 + k * 2 * k * 2
                 + q_tile * k * out_bytes)
    interm = 4 * (q_tile * k + t * 2 * k + heads * q_tile * t + heads * q_tile * s) \
        + 2 * (q_tile * k + t * 2 * k + heads * q_tile * t)
    vmem_limit = int(max(4 << 20, min(2 * (tiles + interm) + (2 << 20), 100 << 20)))

    kernel = functools.partial(_self_attn_kernel, heads=heads, mask_mode=mask_mode)

    return pl.pallas_call(
        kernel,
        out_shape=jax.ShapeDtypeStruct((b, t, k), x.dtype),
        grid_spec=pltpu.PrefetchScalarGridSpec(
            num_scalar_prefetch=0,
            grid=(b, n_q),
            in_specs=[
                # query-row tile of x
                pl.BlockSpec((pl.Squeezed(), q_tile, k), lambda bi, qi: (bi, qi, 0)),
                # full-sequence x for K/V (same HBM array, different window)
                pl.BlockSpec((pl.Squeezed(), t, k), lambda bi, qi: (bi, 0, 0)),
                pl.BlockSpec((k, k), lambda bi, qi: (0, 0)),
                pl.BlockSpec((k, 2 * k), lambda bi, qi: (0, 0)),
            ],
            out_specs=pl.BlockSpec((pl.Squeezed(), q_tile, k),
                                   lambda bi, qi: (bi, qi, 0)),
        ),
        compiler_params=pltpu.CompilerParams(
            dimension_semantics=("parallel", "parallel"),
            vmem_limit_bytes=vmem_limit,
        ),
    )(x_bf, x_bf, w_q, w_kv)


def _reference(x, wq, wk, wv, heads=4, mask_mode=False):
    b, t, k = x.shape
    s = k // heads
    q = x @ wq.T
    kk = x @ wk.T
    v = x @ wv.T
    q = q.reshape(b, t, heads, s).transpose(0, 2, 1, 3)
    kk = kk.reshape(b, t, heads, s).transpose(0, 2, 1, 3)
    v = v.reshape(b, t, heads, s).transpose(0, 2, 1, 3)
    w = jnp.einsum("bhts,bhus->bhtu", q, kk)
    if mask_mode:
        row = jnp.arange(t)[:, None]
        col = jnp.arange(t)[None, :]
        w = jnp.where(col > row, -jnp.inf, w)
    else:
        w = w / math.sqrt(k)
    w = jax.nn.softmax(w, axis=-1)
    out = jnp.einsum("bhtu,bhus->bhts", w, v)
    return out.transpose(0, 2, 1, 3).reshape(b, t, k)


if __name__ == "__main__":
    b, t, k, heads = 2, 8, 32, 4

    key = jax.random.PRNGKey(0)
    kx, kq, kk_, kv = jax.random.split(key, 4)

    x = jax.random.normal(kx, (b, t, k), dtype=jnp.float32)
    # deterministic init mimicking nn.Linear (uniform in +-1/sqrt(k))
    lim = 1.0 / math.sqrt(k)
    wq = jax.random.uniform(kq, (k, k), jnp.float32, -lim, lim)
    wk = jax.random.uniform(kk_, (k, k), jnp.float32, -lim, lim)
    wv = jax.random.uniform(kv, (k, k), jnp.float32, -lim, lim)

    # Tolerance loosened vs exact f32: bf16 matmul operands (f32 accumulation)
    # and approx EUP reciprocal in the softmax.
    for mask_mode in (False, True):
        out = self_attention(x, wq, wk, wv, heads=heads, mask_mode=mask_mode)
        out = jax.block_until_ready(out)
        ref = _reference(x, wq, wk, wv, heads=heads, mask_mode=mask_mode)
        assert out.shape == (b, t, k)
        assert jnp.allclose(out, ref, atol=3e-2, rtol=3e-2), (
            f"mismatch vs reference (mask_mode={mask_mode}), "
            f"max abs err {float(jnp.max(jnp.abs(out - ref)))}"
        )

    print("KERNEL_OK")
</pallas_src>

<mosaic_0001>
module attributes {stable_mosaic.version = 11 : i64} {
  func.func @_self_attn_kernel(%arg0: i32, %arg1: i32, %arg2: memref<1x8x32xbf16, #tpu.memory_space<vmem>>, %arg3: memref<1x8x32xbf16, #tpu.memory_space<vmem>>, %arg4: memref<32x32xbf16, #tpu.memory_space<vmem>>, %arg5: memref<32x64xbf16, #tpu.memory_space<vmem>>, %arg6: memref<1x8x32xf32, #tpu.memory_space<vmem>>) attributes {dimension_semantics = [#tpu.dimension_semantics<parallel>, #tpu.dimension_semantics<parallel>], iteration_bounds = array<i64: 2, 1>, scalar_prefetch = 0 : i64, scratch_operands = 0 : i64, tpu.core_type = #tpu.core_type<tc>, window_params = [{transform_indices = @transform_0, window_bounds = array<i64: 1, 8, 32>}, {transform_indices = @transform_1, window_bounds = array<i64: 1, 8, 32>}, {pipeline_mode = #tpu.pipeline_mode<synchronous>, transform_indices = @transform_2, window_bounds = array<i64: 32, 32>}, {pipeline_mode = #tpu.pipeline_mode<synchronous>, transform_indices = @transform_3, window_bounds = array<i64: 32, 64>}, {transform_indices = @transform_4, window_bounds = array<i64: 1, 8, 32>}]} {
    %c0 = arith.constant 0 : index
    %c0_0 = arith.constant 0 : index
    %c0_1 = arith.constant 0 : index
    %0 = vector.load %arg2[%c0, %c0_0, %c0_1] : memref<1x8x32xbf16, #tpu.memory_space<vmem>>, vector<1x8x32xbf16>
    %1 = vector.shape_cast %0 : vector<1x8x32xbf16> to vector<8x32xbf16>
    %c0_2 = arith.constant 0 : index
    %c0_3 = arith.constant 0 : index
    %2 = vector.load %arg4[%c0_2, %c0_3] : memref<32x32xbf16, #tpu.memory_space<vmem>>, vector<32x32xbf16>
    %cst = arith.constant dense<0.000000e+00> : vector<8x32xf32>
    %3 = tpu.matmul %1, %2, %cst {dimension_numbers = #tpu.dot_dimension_numbers<[1], [0], [0], [1], [0, 0, 1, 1], [], []>} : vector<8x32xbf16>, vector<32x32xbf16>, vector<8x32xf32> -> vector<8x32xf32>
    %c0_4 = arith.constant 0 : index
    %c0_5 = arith.constant 0 : index
    %c0_6 = arith.constant 0 : index
    %4 = vector.load %arg3[%c0_4, %c0_5, %c0_6] : memref<1x8x32xbf16, #tpu.memory_space<vmem>>, vector<1x8x32xbf16>
    %5 = vector.shape_cast %4 : vector<1x8x32xbf16> to vector<8x32xbf16>
    %c0_7 = arith.constant 0 : index
    %c0_8 = arith.constant 0 : index
    %6 = vector.load %arg5[%c0_7, %c0_8] : memref<32x64xbf16, #tpu.memory_space<vmem>>, vector<32x64xbf16>
    %cst_9 = arith.constant dense<0.000000e+00> : vector<8x64xf32>
    %7 = tpu.matmul %5, %6, %cst_9 {dimension_numbers = #tpu.dot_dimension_numbers<[1], [0], [0], [1], [0, 0, 1, 1], [], []>} : vector<8x32xbf16>, vector<32x64xbf16>, vector<8x64xf32> -> vector<8x64xf32>
    %8 = arith.truncf %3 : vector<8x32xf32> to vector<8x32xbf16>
    %9 = vector.shape_cast %8 : vector<8x32xbf16> to vector<8x4x8xbf16>
    %10 = tpu.transpose %9, [1, 0, 2] : vector<8x4x8xbf16> -> vector<4x8x8xbf16>
    %11 = vector.extract_strided_slice %7 {offsets = [0, 0], sizes = [8, 32], strides = [1, 1]} : vector<8x64xf32> to vector<8x32xf32>
    %12 = arith.truncf %11 : vector<8x32xf32> to vector<8x32xbf16>
    %13 = vector.shape_cast %12 : vector<8x32xbf16> to vector<8x4x8xbf16>
    %14 = tpu.transpose %13, [1, 0, 2] : vector<8x4x8xbf16> -> vector<4x8x8xbf16>
    %15 = vector.extract_strided_slice %7 {offsets = [0, 32], sizes = [8, 32], strides = [1, 1]} : vector<8x64xf32> to vector<8x32xf32>
    %16 = arith.truncf %15 : vector<8x32xf32> to vector<8x32xbf16>
    %17 = vector.shape_cast %16 : vector<8x32xbf16> to vector<8x4x8xbf16>
    %18 = tpu.transpose %17, [1, 0, 2] : vector<8x4x8xbf16> -> vector<4x8x8xbf16>
    "tpu.trace_start"() <{level = 10 : i32, message = "hqd,hkd->hqk"}> : () -> ()
    %cst_10 = arith.constant dense<0.000000e+00> : vector<4x8x8xf32>
    %19 = tpu.matmul %10, %14, %cst_10 {dimension_numbers = #tpu.dot_dimension_numbers<[2], [2], [1], [1], [0, 0, 0, 1, 1, 1], [0], [0]>} : vector<4x8x8xbf16>, vector<4x8x8xbf16>, vector<4x8x8xf32> -> vector<4x8x8xf32>
    "tpu.trace_stop"() : () -> ()
    %cst_11 = arith.constant dense<0xFF800000> : vector<4x8xf32>
    %20 = vector.multi_reduction <maximumf>, %19, %cst_11 [2] : vector<4x8x8xf32> to vector<4x8xf32>
    %21 = vector.shape_cast %20 : vector<4x8xf32> to vector<4x8x1xf32>
    %22 = vector.broadcast %21 : vector<4x8x1xf32> to vector<4x8x8xf32>
    %23 = arith.subf %19, %22 : vector<4x8x8xf32>
    %24 = math.exp %23 : vector<4x8x8xf32>
    %cst_12 = arith.constant dense<0.000000e+00> : vector<4x8xf32>
    %25 = vector.multi_reduction <add>, %24, %cst_12 [2] : vector<4x8x8xf32> to vector<4x8xf32>
    %26 = vector.shape_cast %25 : vector<4x8xf32> to vector<4x8x1xf32>
    %27 = tpu.reciprocal %26 {approx = true} : vector<4x8x1xf32> -> vector<4x8x1xf32>
    %28 = vector.broadcast %27 : vector<4x8x1xf32> to vector<4x8x8xf32>
    %29 = arith.mulf %24, %28 : vector<4x8x8xf32>
    %30 = arith.truncf %29 : vector<4x8x8xf32> to vector<4x8x8xbf16>
    "tpu.trace_start"() <{level = 10 : i32, message = "hqk,hkd->hqd"}> : () -> ()
    %cst_13 = arith.constant dense<0.000000e+00> : vector<4x8x8xf32>
    %31 = tpu.matmul %30, %18, %cst_13 {dimension_numbers = #tpu.dot_dimension_numbers<[2], [1], [1], [2], [0, 0, 0, 1, 1, 2], [0], [0]>} : vector<4x8x8xbf16>, vector<4x8x8xbf16>, vector<4x8x8xf32> -> vector<4x8x8xf32>
    "tpu.trace_stop"() : () -> ()
    %32 = tpu.transpose %31, [1, 0, 2] : vector<4x8x8xf32> -> vector<8x4x8xf32>
    %33 = vector.shape_cast %32 : vector<8x4x8xf32> to vector<8x32xf32>
    %c0_14 = arith.constant 0 : index
    %c0_15 = arith.constant 0 : index
    %c0_16 = arith.constant 0 : index
    %34 = vector.load %arg6[%c0_14, %c0_15, %c0_16] : memref<1x8x32xf32, #tpu.memory_space<vmem>>, vector<1x8x32xf32>
    %35 = vector.shape_cast %34 : vector<1x8x32xf32> to vector<8x32xf32>
    %36 = vector.shape_cast %33 : vector<8x32xf32> to vector<1x8x32xf32>
    tpu.vector_store %arg6[%c0_14, %c0_15, %c0_16], %36 {strides = array<i32>} : memref<1x8x32xf32, #tpu.memory_space<vmem>>, vector<1x8x32xf32>,
    return
  }
  func.func @transform_0(%arg0: i32, %arg1: i32) -> (i32, i32, i32) {
    %c0_i32 = arith.constant 0 : i32
    %c0_i32_0 = arith.constant 0 : i32
    return %arg0, %arg1, %c0_i32 : i32, i32, i32
  }
  func.func @transform_1(%arg0: i32, %arg1: i32) -> (i32, i32, i32) {
    %c0_i32 = arith.constant 0 : i32
    %c0_i32_0 = arith.constant 0 : i32
    %c0_i32_1 = arith.constant 0 : i32
    return %arg0, %c0_i32, %c0_i32_0 : i32, i32, i32
  }
  func.func @transform_2(%arg0: i32, %arg1: i32) -> (i32, i32) {
    %c0_i32 = arith.constant 0 : i32
    %c0_i32_0 = arith.constant 0 : i32
    %c0_i32_1 = arith.constant 0 : i32
    return %c0_i32, %c0_i32_0 : i32, i32
  }
  func.func @transform_3(%arg0: i32, %arg1: i32) -> (i32, i32) {
    %c0_i32 = arith.constant 0 : i32
    %c0_i32_0 = arith.constant 0 : i32
    %c0_i32_1 = arith.constant 0 : i32
    return %c0_i32, %c0_i32_0 : i32, i32
  }
  func.func @transform_4(%arg0: i32, %arg1: i32) -> (i32, i32, i32) {
    %c0_i32 = arith.constant 0 : i32
    %c0_i32_0 = arith.constant 0 : i32
    return %arg0, %arg1, %c0_i32 : i32, i32, i32
  }
}

</mosaic_0001>

<bundles_post_ra>
// kernel: tpu_custom_call.1
= control target key start
LH: loop header
LB: loop body
LE: loop exit
PB: predicated region body
PF: predicated region fallthrough
CT: control target
= control target key end

     0   :  { %s2595_s0 = inlined_call_operand.hbm [shape: bf16[2,8,32], index: 0, kind: input, shape index: {}]   ;;  %s2596_s1 = inlined_call_operand.hbm [shape: bf16[2,8,32], index: 1, kind: input, shape index: {}]   ;;  %s2597_s2 = inlined_call_operand.hbm [shape: bf16[32,32], index: 2, kind: input, shape index: {}]   ;;  %s2598_s3 = inlined_call_operand.hbm [shape: bf16[32,64], index: 3, kind: input, shape index: {}]   ;;  %s2599_s4 = inlined_call_operand.hbm [shape: f32[2,8,32], index: 4, kind: output, shape index: {}]  }
   0x1   :  { %2605 = sst [smem:[#allocation17_spill]] %s2597_s2 }
   0x2   :  { %2606 = sst [smem:[#allocation18_spill]] %s2598_s3 }
   0x3   :  { %9 = vsyncpa [#allocation3], 0 }
   0x4   :  { %11 = vsyncpa [#allocation3 + $0x1], 0 }
   0x5   :  { %12 = vsyncpa [#allocation6], 0 }
   0x6   :  { %14 = vsyncpa [#allocation6 + $0x1], 0 }
   0x7   :  { %15 = vsyncpa [#allocation9], 0 }
   0x8   :  { %16 = vsyncpa [#allocation4], 0 }
   0x9   :  { %18 = vsyncpa [#allocation4 + $0x1], 0  ;;  %s2135_s15 = smov 0   ;;  %s2137_s16 = smov 0  }
   0xa   :  { %s2139_s17 = smov 0   ;;  %s2141_s18 = smov 0  }
   0xb   :  { %s2143_s19 = smov 0   ;;  %s2145_s20 = smov 0  }
   0xc LB: > { %s2166_s21 = sadd.s32 4294967295, %s2089_s20   ;;  %s1636_s22 = sadd.s32 4294967294, %s2089_s20   ;;  %s2089_s20 = sphi %s2145_s20, %s24_s20   ;;  %s2085_s19 = sphi %s2143_s19, %s2631_s19   ;;  %s2081_s18 = sphi %s2141_s18, %s2630_s18   ;;  %s2077_s17 = sphi %s2139_s17, %s2629_s17   ;;  %s2073_s16 = sphi %s2137_s16, %s2628_s16   ;;  %s2069_s15 = sphi %s2135_s15, %s2627_s15  }
   0xd   : > { %p58_p0 = scmp.ne.s32.totalorder %s2073_s16, %s2069_s15  ;;  %p2600_p1 = scmp.eq.s32.totalorder %s2166_s21, 0 }
   0xe   : > { %p158_p3 = scmp.eq.s32.totalorder %s1636_s22, 1  ;;  %p1637_p5 = scmp.ge.s32.totalorder %s2089_s20, 1 }
   0xf   : > { %p2175_p4 = por %p2600_p1, %p58_p0  ;;  %p165_p7 = scmp.lt.s32.totalorder %s2089_s20, 3 }
  0x10   : > { %p2180_p6 = por %p158_p3, %p58_p0  ;;  %s2091_s26 = smov [#allocation7]  }
  0x11   : > { %s2607_s23 = scalar_select %p2175_p4, 1, 0 }
  0x12   : > { %s2608_s24 = scalar_select %p2180_p6, 1, 0 }
  0x13   : > { %p2185_p8 = pnand %p1637_p5, %p165_p7  ;;  %s177_s27 = sshll.u32 %s2091_s26, 4  ;;  %s2189_s27 = int_to_ptr.vmem [resolvable:$true] %s177_s27 }
  0x14   : > { %s2092_s29 = smov [#allocation8]   ;;  %s2611_s2 = sld [smem:[#allocation17_spill]] }
  0x15   : > { %s2609_s25 = scalar_select %p2185_p8, 1, 0 }
  0x16   : > { %p1771_p9 = pneg %p2185_p8  ;;  %s190_s30 = sshll.u32 %s2092_s29, 4  ;;  %s2200_s30 = int_to_ptr.vmem [resolvable:$true] %s190_s30 }
  0x18   : > { %p2196_p11 = pnand %p1771_p9, %p2600_p1 }
  0x1a   : > { %s1879_s7 = scalar_lea.hbm %s2611_s2, 256  ;;  %p1881_p13 = pneg %p2196_p11 }
  0x1b   : > { %p1880_p12 = scmp.ne.s32.totalorder %s2611_s2, %s1879_s7  ;;  %p1886_p5 = scmp.lt.u32.totalorder %s1879_s7, %s2611_s2 }
  0x1d   : > { %p1882_p0 = pnand %p1881_p13, %p1880_p12 }
  0x1f   : > { %p1883_p3 = pneg %p1882_p0 }
  0x21   : > { %p1888_p7 = pnand %p1886_p5, %p1883_p3 }
  0x23   : > { %1891 = shalt.err (!%p1888_p7)
}
  0x24   : > { %s1892_s12 = scalar_lea.vmem %s2189_s27, 256  ;;  %p1900_p2 = scmp.lt.s32.totalorder %s2189_s27, %s2189_s27 }
  0x25   : > { %p1893_p9 = scmp.ne.s32.totalorder %s2189_s27, %s1892_s12  ;;  %p1901_p12 = scmp.lt.s32.totalorder %s1892_s12, %s1892_s12 }
  0x27   : > { %p1895_p10 = pnand %p1893_p9, %p1881_p13  ;;  %p1902_p0 = por %p1901_p12, %p1900_p2 }
  0x29   : > { %p1896_p1 = pneg %p1895_p10 }
  0x2b   : > { %p1903_p6 = pnand %p1902_p0, %p1896_p1 }
  0x2d   : > { %1906 = shalt.err (!%p1903_p6)
}
  0x2e   : > { %s2093_s13 = smov 64   ;;  %s2094_s14 = smov 4  }
  0x2f   : > { %1774 = dma.hbm_to_vmem [thread:$0]  (!%p2196_p11), %s2611_s2, 256, %s2189_s27, [#allocation6], %s2093_s13, %s2093_s13, %s2094_s14  }
  0x30   : > { %s2612_s3 = sld [smem:[#allocation18_spill]] }
  0x36   : > { %s1907_s6 = scalar_lea.hbm %s2612_s3, 256 }
  0x37   : > { %p1908_p2 = scmp.ne.s32.totalorder %s2612_s3, %s1907_s6  ;;  %p1914_p10 = scmp.lt.u32.totalorder %s1907_s6, %s2612_s3 }
  0x39   : > { %p1910_p1 = pnand %p1908_p2, %p1881_p13 }
  0x3b   : > { %p1911_p6 = pneg %p1910_p1 }
  0x3d   : > { %p1916_p3 = pnand %p1914_p10, %p1911_p6 }
  0x3f   : > { %1919 = shalt.err (!%p1916_p3)
}
  0x40   : > { %s1920_s27 = scalar_lea.vmem %s2200_s30, 256  ;;  %p1928_p12 = scmp.lt.s32.totalorder %s2200_s30, %s2200_s30 }
  0x41   : > { %p1921_p5 = scmp.ne.s32.totalorder %s2200_s30, %s1920_s27  ;;  %p1929_p0 = scmp.lt.s32.totalorder %s1920_s27, %s1920_s27 }
  0x43   : > { %p1923_p7 = pnand %p1921_p5, %p1881_p13  ;;  %p1930_p2 = por %p1929_p0, %p1928_p12 }
  0x45   : > { %p1924_p9 = pneg %p1923_p7 }
  0x47   : > { %p1931_p1 = pnand %p1930_p2, %p1924_p9 }
  0x49   : > { %1934 = shalt.err (!%p1931_p1)
}
  0x4a   : > { %1777 = dma.hbm_to_vmem [thread:$0]  (!%p2196_p11), %s2612_s3, 256, %s2200_s30, [#allocation9], %s2093_s13, %s2093_s13, %s2094_s14  }
  0x4b   : > { %s36_s22 = sadd.s32 1, %s2085_s19  ;;  %s45_s26 = sadd.s32 1, %s2077_s17 }
  0x4c   : > { %p38_p13 = scmp.ge.s32.totalorder %s36_s22, 2  ;;  %p52_p6 = scmp.ne.s32.totalorder %s2077_s17, %s2073_s16 }
  0x4d   : > { %p53_p10 = scmp.eq.s32.totalorder %s2089_s20, 0  ;;  %p1791_p3 = scmp.lt.s32.totalorder %s2089_s20, 2 }
  0x4e   : > { %s2633_s22 = smov (%p38_p13, %s36_s22), 0  ;;  %p2614_p7 = scmp.eq.s32.totalorder %s2166_s21, 1 }
  0x4f   : > { %2613 = sst [smem:[#allocation16_spill]] %s2633_s22  ;;  %p54_p5 = por %p53_p10, %p52_p6 }
  0x50   : > { %p2264_p9 = por %p2614_p7, %p52_p6  ;;  %s40_s29 = ssub.s32 %s2085_s19, %s2633_s22 }
  0x51   : > { %s204_s5 = sand.u32 1, %s2077_s17   ;;  %p43_p12 = scmp.eq.s32.totalorder %s40_s29, 0 }
  0x52   : > { %s2615_s28 = scalar_select %p2264_p9, 1, 0 }
  0x53   : > { %s2271_s30 = sshll.u32 %s204_s5, 2  ;;  %s1642_s13 = sshll.u32 %s2085_s19, 6 }
  0x54   : > { %s2275_s14 = scalar_select %p43_p12, %s2077_s17, %s45_s26  }
  0x55   : > { %s2280_s8 = scalar_lea.hbm %s2595_s0, %s1642_s13  ;;  %s208_s9 = scalar_lea.vmem [#allocation2], %s2271_s30 }
  0x56   : > { %s216_s10 = sshll.u32 %s208_s9, 4  ;;  %p2285_p11 = pnand %p1791_p3, %p54_p5  ;;  %s2289_s10 = int_to_ptr.vmem [resolvable:$true] %s216_s10 }
  0x57   : > { %s2294_s26 = scalar_lea.hbm %s2596_s1, %s1642_s13  ;;  %s205_s29 = scalar_lea.sflag [#allocation3], %s204_s5 }
  0x58   : > { %s1935_s6 = scalar_lea.hbm %s2280_s8, 64  ;;  %p1937_p2 = pneg %p2285_p11 }
  0x59   : > { %p1936_p0 = scmp.ne.s32.totalorder %s2280_s8, %s1935_s6  ;;  %s1940_s2 = scalar_lea.hbm %s2595_s0, 128 }
  0x5a   : > { %p1941_p6 = scmp.lt.u32.totalorder %s2280_s8, %s2595_s0  ;;  %p1942_p10 = scmp.lt.u32.totalorder %s1940_s2, %s1935_s6 }
  0x5b   : > { %p1938_p1 = pnand %p1937_p2, %p1936_p0  ;;  %p1944_p5 = scmp.lt.u32.totalorder %s1935_s6, %s2280_s8 }
  0x5c   : > { %p1943_p3 = por %p1942_p10, %p1941_p6 }
  0x5d   : > { %p1939_p13 = pneg %p1938_p1 }
  0x5e   : > { %p1945_p7 = por %p1944_p5, %p1943_p3 }
  0x60   : > { %p1946_p12 = pnand %p1945_p7, %p1939_p13 }
  0x62   : > { %1949 = shalt.err (!%p1946_p12)
}
  0x63   : > { %s1950_s5 = scalar_lea.vmem %s2289_s10, 64  ;;  %s2095_s13 = smov [#allocation2]  }
  0x64   : > { %p1951_p0 = scmp.ne.s32.totalorder %s2289_s10, %s1950_s5  ;;  %s1955_s11 = sshll.u32 %s2095_s13, 4  ;;  %s1956_s11 = int_to_ptr.vmem [resolvable:$false] %s1955_s11 }
  0x65   : > { %s1957_s3 = scalar_lea.vmem %s1956_s11, 128  ;;  %p1958_p4 = scmp.lt.s32.totalorder %s2289_s10, %s1956_s11 }
  0x66   : > { %p1953_p1 = pnand %p1951_p0, %p1937_p2  ;;  %p1959_p6 = scmp.lt.s32.totalorder %s1957_s3, %s1950_s5 }
  0x68   : > { %p1954_p9 = pneg %p1953_p1  ;;  %p1960_p10 = por %p1959_p6, %p1958_p4 }
  0x6a   : > { %p1961_p3 = pnand %p1960_p10, %p1954_p9 }
  0x6c   : > { %1964 = shalt.err (!%p1961_p3)
}
  0x6d   : > { %1781 = dma.hbm_to_vmem [thread:$0]  (!%p2285_p11), %s2280_s8, 64, %s2289_s10, %s205_s29  }
  0x6e   : > { %s223_s2 = sand.u32 1, %s2089_s20   ;;  %s227_s22 = scalar_lea.vmem [#allocation5], %s2271_s30 }
  0x6f   : > { %s234_s12 = sshll.u32 %s227_s22, 4  ;;  %s224_s6 = scalar_lea.sflag [#allocation6], %s223_s2  ;;  %s235_s12 = int_to_ptr.vmem [resolvable:$true] %s234_s12 }
  0x70   : > { %s1965_s7 = scalar_lea.hbm %s2294_s26, 64  ;;  %s1970_s13 = scalar_lea.hbm %s2596_s1, 128 }
  0x71   : > { %p1966_p4 = scmp.ne.s32.totalorder %s2294_s26, %s1965_s7  ;;  %p1971_p5 = scmp.lt.u32.totalorder %s2294_s26, %s2596_s1 }
  0x72   : > { %p1972_p7 = scmp.lt.u32.totalorder %s1970_s13, %s1965_s7  ;;  %p1974_p0 = scmp.lt.u32.totalorder %s1965_s7, %s2294_s26 }
  0x73   : > { %p1968_p9 = pnand %p1966_p4, %p1937_p2 }
  0x74   : > { %p1973_p12 = por %p1972_p7, %p1971_p5 }
  0x75   : > { %p1969_p13 = pneg %p1968_p9 }
  0x76   : > { %p1975_p1 = por %p1974_p0, %p1973_p12 }
  0x78   : > { %p1976_p6 = pnand %p1975_p1, %p1969_p13 }
  0x7a   : > { %1979 = shalt.err (!%p1976_p6)
}
  0x7b   : > { %s1980_s30 = scalar_lea.vmem %s235_s12, 64  ;;  %s2096_s8 = smov [#allocation5]  }
  0x7c   : > { %p1981_p10 = scmp.ne.s32.totalorder %s235_s12, %s1980_s30  ;;  %s1985_s10 = sshll.u32 %s2096_s8, 4  ;;  %s1986_s10 = int_to_ptr.vmem [resolvable:$false] %s1985_s10 }
  0x7d   : > { %s1987_s29 = scalar_lea.vmem %s1986_s10, 128  ;;  %p1988_p9 = scmp.lt.s32.totalorder %s235_s12, %s1986_s10 }
  0x7e   : > { %p1983_p3 = pnand %p1981_p10, %p1937_p2  ;;  %p1989_p8 = scmp.lt.s32.totalorder %s1987_s29, %s1980_s30 }
  0x80   : > { %p1984_p4 = pneg %p1983_p3  ;;  %p1990_p5 = por %p1989_p8, %p1988_p9 }
  0x82   : > { %p1991_p7 = pnand %p1990_p5, %p1984_p4 }
  0x84   : > { %1994 = shalt.err (!%p1991_p7)
}
  0x85   : > { %1784 = dma.hbm_to_vmem [thread:$0]  (!%p2285_p11), %s2294_s26, 64, %s235_s12, %s224_s6  }
  0x86   : > { %p2617_p13 = scmp.ne.s32.totalorder %s2609_s25, 0 }
  0x87   : > { %s2345_s2 = sand.u32 (!%p2617_p13), 1, %s2073_s16   ;;  %p2618_p2 = scmp.ne.s32.totalorder (!%p2617_p13), %s2607_s23, 0 }
  0x88   : > { %243 = sbr.rel (%p2617_p13) target bundleno = 1478 (0x5c6), region = 36  ;;  %s1646_s22 = sshll.u32 (!%p2617_p13), %s2345_s2, 2 }
  0x89   : > { %s246_s7 = scalar_lea.sflag (!%p2617_p13), [#allocation3], %s2345_s2  ;;  %s249_s9 = scalar_lea.vmem (!%p2617_p13), [#allocation2], %s1646_s22 }
  0x8f   : > { %2048 = dma.done.wait (%p2618_p2), %s246_s7, 64  }
  0x90   : > { %2050 = vsyncadd (%p2618_p2), %s246_s7, 4294967232  ;;  %s254_s27 = sand.u32 1, %s2166_s21   ;;  %s258_s25 = scalar_lea.vmem [#allocation5], %s1646_s22 }
  0x91   : > { %s255_s26 = scalar_lea.sflag [#allocation6], %s254_s27 }
  0x92   : > { %2052 = dma.done.wait (%p2618_p2), %s255_s26, 64  }
  0x93   : > { %2054 = vsyncadd (%p2618_p2), %s255_s26, 4294967232  ;;  %p2619_p8 = scmp.eq.s32.totalorder %s2166_s21, 0 }
  0x95   : > { %2056 = dma.done.wait (%p2619_p8), [#allocation6], 256   ;;  %p2620_p11 = pmov %p2619_p8 }
  0x96   : > { %p2621_p12 = pmov %p2619_p8 }
  0x97   : > { %2058 = vsyncadd (%p2620_p11), [#allocation6], 4294967040 }
  0x98   : > { %2060 = dma.done.wait (%p2621_p12), [#allocation9], 256   ;;  %p2622_p0 = pmov %p2619_p8 }
  0x99   : > { %v2097_v0 = vmov 0.0   ;;  %vm2098_vm0 = vmmov 0   ;;  %v1859_v1 = vld [vmem:[#allocation8] sm:$0xff]   ;;  %v1860_v2 = vld [vmem:[#allocation7] sm:$0xff]   ;;  %v1861_v3 = vld [vmem:[#allocation8 + $0x8] sm:$0xff]   ;;  %vm314_vm1 = vcmask 261120   ;;  %v429_v19 = vlaneseq }
  0x9a   : > { %2062 = vsyncadd (%p2622_p0), [#allocation9], 4294967040  ;;  %1701 = vmatprep.subr.bf16.mxu1 %v2097_v0  ;;  %1693 = vmatprep.subr.bf16.mxu0 %v2097_v0  ;;  %v1862_v4 = vld [vmem:[#allocation7 + $0x8] sm:$0xff]   ;;  %v358_v5 = vld [vmem:[%s258_s25] sm:$0xf]  ;;  %s2099_s21 = smov 104  }
  0x9b   : > { %1705 = vmatprep.mubr.msk.bf16.mxu1 %vm2098_vm0, %v2097_v0  ;;  %1697 = vmatprep.mubr.msk.bf16.mxu0 %vm2098_vm0, %v2097_v0  ;;  %v297_v6 = vld [vmem:[%s249_s9] sm:$0xf]  ;;  %s2100_s23 = smov 120   ;;  %s2101_s12 = smov 112   ;;  %v2102_v17 = vmov 1983009808  }
  0x9c   : > { %1702 = vmatpush3.bf16.msra.mxu1 %v1859_v1  ;;  %1694 = vmatpush3.bf16.msra.mxu0 %v1860_v2  ;;  %v427_v18 = vunpack.c.l.s4 %v2102_v17  ;;  %v2103_v20 = vmov 1934713408   ;;  %v430_v23 = vshrl.u32 %v429_v19, 7  ;;  %v2104_v39 = vmov 0   ;;  %s2105_s6 = smov 96   ;;  %s2106_s5 = smov 16  }
  0x9d   : > { %1703 = vmatprep.subr.bf16.mxu1 %v2097_v0  ;;  %1695 = vmatprep.subr.bf16.mxu0 %v2097_v0  ;;  %v444_v21 = vunpack.c.l.s4 %v2103_v20  ;;  %vm926_vm2 = vcmask 64512   ;;  %vm1162_vm3 = vcmask 1043456   ;;  %s2107_s13 = smov 8   ;;  %s2108_s11 = smov 24   ;;  %vm1493_vm4 = vcmask 130048  }
  0x9e   : > { %v428_v22 = vunpack.c.0.s8 %v427_v18  ;;  %s1650_s3 = sshll.u32 %s2345_s2, 3  ;;  %s1668_s30 = sshll.u32 %s2081_s18, 7  ;;  %vm1495_vm5 = vcmask 195584  }
  0x9f   : > { %v445_v24 = vunpack.c.0.s8 %v444_v21  ;;  %s295_s8 = scalar_lea.vmem [#allocation10], %s1650_s3  ;;  %s2545_s7 = scalar_lea.hbm %s2599_s4, %s1668_s30 }
  0xa0   : > { %1704 = vmatpush3.bf16.msra.mxu1 %v1861_v3  ;;  %1696 = vmatpush3.bf16.msra.mxu0 %v1862_v4  ;;  %v2387_v25 = vsub.s32 %v428_v22, %v430_v23  ;;  %s1513_s10 = sshll.u32 %s295_s8, 4  ;;  %s1499_s9 = scalar_lea.sflag [#allocation4], %s2345_s2  ;;  %s2547_s10 = int_to_ptr.vmem [resolvable:$true] %s1513_s10 }
  0xa1   : > { %1715 = vmatprep.subr.bf16.mxu1 %v2097_v0  ;;  %1709 = vmatprep.subr.bf16.mxu0 %v2097_v0  ;;  %v2395_v29 = vsub.s32 %v445_v24, %v430_v23  ;;  %s1995_s18 = scalar_lea.vmem %s2547_s10, 128  ;;  %p2623_p6 = scmp.ne.s32.totalorder %s2615_s28, 0 }
  0xa2   : > { %p1996_p1 = scmp.ne.s32.totalorder %s2547_s10, %s1995_s18  ;;  %s2109_s27 = smov [#allocation10]  }
  0xa3   : > { %1706 = vmatmul.mubr.msk.bf16.vlgmr.msra.gmra.mrb[0].mxu1 %vm314_vm1, %v358_v5  ;;  %1698 = vmatmul.mubr.msk.bf16.vlgmr.msra.gmra.mrb[0].mxu0 %vm314_vm1, %v297_v6  ;;  %s1999_s26 = sshll.u32 %s2109_s27, 4  ;;  %s2000_s26 = int_to_ptr.vmem [resolvable:$false] %s1999_s26 }
  0xa4   : > { %1717 = vmatprep.mubr.msk.bf16.mxu1 %vm2098_vm0, %v2097_v0  ;;  %1711 = vmatprep.mubr.msk.bf16.mxu0 %vm2098_vm0, %v2097_v0  ;;  %p1997_p10 = pnand %p1996_p1, %p2623_p6  ;;  %s2001_s25 = scalar_lea.vmem %s2000_s26, 256 }
  0xa5   : > { %p2002_p4 = scmp.lt.s32.totalorder %s2547_s10, %s2000_s26  ;;  %p2003_p9 = scmp.lt.s32.totalorder %s2001_s25, %s1995_s18 }
  0xa6   : > { %p1998_p3 = pneg %p1997_p10 }
  0xa7   : > { %p2004_p5 = por %p2003_p9, %p2002_p4 }
  0xa9   : > { %p2005_p7 = pnand %p2004_p5, %p1998_p3 }
 0x176   : > { %v412_v7 = vpop.f32.mrb[0].mxu1  ;;  %v352_v10 = vpop.f32.mrb[0].mxu0 }
 0x177   : > { %v2382_v8 = vpack.c.bf16 %v412_v7, %v412_v7  ;;  %v1707_v9 = vpop.f32.mrb[1].mxu1  ;;  %v1699_v12 = vpop.f32.mrb[1].mxu0  ;;  %v418_v14 = vpack.c.bf16 %v352_v10, %v352_v10 }
 0x178   : > { %v415_v11 = vpop.f32.mrb[2].mxu1  ;;  %v355_v15 = vpop.f32.mrb[2].mxu0 }
 0x179   : > { %593 = vrot.lane.b32.xlu1 %v2382_v8, %s2099_s21  ;;  %589 = vrot.lane.b32.xlu0 %v2382_v8, %s2100_s23  ;;  %v1708_v13 = vpop.f32.mrb[3].mxu1  ;;  %v1700_v16 = vpop.f32.mrb[3].mxu0  ;;  %v601_v38 = vrot.slane %v2382_v8, %v2387_v25  ;;  %v432_v46 = vrot.slane %v418_v14, %v2387_v25 }
 0x17d   : > { %591 = vrot.lane.b32.xlu0 %v2382_v8, %s2101_s12  ;;  %420 = vrot.lane.b32.xlu1 %v418_v14, %s2100_s23 }
 0x181   : > { %422 = vrot.lane.b32.xlu0 %v418_v14, %s2101_s12  ;;  %424 = vrot.lane.b32.xlu1 %v418_v14, %s2099_s21 }
 0x1eb   : > { %v2389_v26 = vpop.permute.xlu1 %593  ;;  %v2391_v27 = vpop.permute.xlu0 %589 }
 0x1ec   : > { %v643_v28 = vrot.slane %v2389_v26, %v2387_v25  ;;  %v635_v30 = vrot.slane %v2391_v27, %v2387_v25 }
 0x1ee   : > { %v644_v31 = vcombine.low %v635_v30, %v643_v28  ;;  %v645_v32 = vcombine.high %v635_v30, %v643_v28 }
 0x1ef   : > { %v2399_v33 = vpop.permute.xlu0 %591  ;;  %v421_v34 = vpop.permute.xlu1 %420 }
 0x1f0   : > { %v652_v35 = vrot.slane %v644_v31, %v2395_v29  ;;  %v659_v36 = vrot.slane %v645_v32, %v2395_v29  ;;  %v609_v37 = vrot.slane %v2399_v33, %v2387_v25  ;;  %v466_v42 = vrot.slane %v421_v34, %v2387_v25 }
 0x1f2   : > { %v660_v40 = vcombine.high %v652_v35, %v2104_v39  ;;  %v661_v41 = vcombine.high %v659_v36, %v2104_v39  ;;  %v610_v43 = vcombine.low %v601_v38, %v609_v37  ;;  %v611_v44 = vcombine.high %v601_v38, %v609_v37 }
 0x1f3   : > { %v423_v45 = vpop.permute.xlu0 %422  ;;  %v425_v47 = vpop.permute.xlu1 %424  ;;  %v667_v48 = vshrl.u32 %v652_v35, 16  ;;  %v683_v49 = vshrl.u32 %v659_v36, 16 }
 0x1f4   : > { %v440_v50 = vrot.slane %v423_v45, %v2387_v25  ;;  %v474_v51 = vrot.slane %v425_v47, %v2387_v25  ;;  %v675_v52 = vshrl.u32 %v660_v40, 16  ;;  %v691_v53 = vshrl.u32 %v661_v41, 16 }
 0x1f5   : > { %v618_v54 = vrot.slane %v610_v43, %v2395_v29  ;;  %v625_v55 = vrot.slane %v611_v44, %v2395_v29 }
 0x1f6   : > { %v441_v56 = vcombine.low %v432_v46, %v440_v50  ;;  %v442_v57 = vcombine.high %v432_v46, %v440_v50  ;;  %v475_v58 = vcombine.low %v466_v42, %v474_v51  ;;  %v476_v59 = vcombine.high %v466_v42, %v474_v51 }
 0x1f7   : > { %v626_v60 = vcombine.high %v618_v54, %v2104_v39  ;;  %v627_v61 = vcombine.high %v625_v55, %v2104_v39  ;;  %v664_v62 = vpack.i.b16 %v652_v35, %v618_v54  ;;  %v666_v63 = vshrl.u32 %v618_v54, 16 }
 0x1f8   : > { %v680_v1 = vpack.i.b16 %v659_v36, %v625_v55  ;;  %v682_v2 = vshrl.u32 %v625_v55, 16  ;;  %v449_v3 = vrot.slane %v441_v56, %v2395_v29  ;;  %v456_v4 = vrot.slane %v442_v57, %v2395_v29 }
 0x1f9   : > { %v668_v5 = vpack.i.b16 %v667_v48, %v666_v63  ;;  %v672_v6 = vpack.i.b16 %v660_v40, %v626_v60  ;;  %v674_v7 = vshrl.u32 %v626_v60, 16  ;;  %v688_v9 = vpack.i.b16 %v661_v41, %v627_v61 }
 0x1fa   : > { %v684_v10 = vpack.i.b16 %v683_v49, %v682_v2  ;;  %v690_v11 = vshrl.u32 %v627_v61, 16  ;;  %v694_v12 = vcombine.low %v664_v62, %v680_v1  ;;  %v457_v13 = vcombine.high %v449_v3, %v2104_v39 }
 0x1fb   : > { %v676_v14 = vpack.i.b16 %v675_v52, %v674_v7  ;;  %v702_v15 = vcombine.low %v672_v6, %v688_v9  ;;  %v458_v16 = vcombine.high %v456_v4, %v2104_v39  ;;  %v497_v19 = vshrl.u32 %v449_v3, 16 }
 0x1fc   : > { %v692_v17 = vpack.i.b16 %v691_v53, %v690_v11  ;;  %v719_v18 = vcombine.low %v668_v5, %v684_v10  ;;  %v505_v20 = vshrl.u32 %v457_v13, 16  ;;  %v513_v21 = vshrl.u32 %v456_v4, 16 }
 0x1fd   : > { %v521_v22 = vshrl.u32 %v458_v16, 16  ;;  %v483_v23 = vrot.slane %v475_v58, %v2395_v29  ;;  %v490_v24 = vrot.slane %v476_v59, %v2395_v29  ;;  %v701_v28 = vrot.slane %v694_v12, %v2387_v25 }
 0x1fe   : > { %v709_v30 = vrot.slane %v702_v15, %v2387_v25  ;;  %v726_v31 = vrot.slane %v719_v18, %v2387_v25  ;;  %v727_v32 = vcombine.low %v676_v14, %v692_v17 }
 0x1ff   : > { %v491_v34 = vcombine.high %v483_v23, %v2104_v39  ;;  %v492_v35 = vcombine.high %v490_v24, %v2104_v39  ;;  %v495_v36 = vpack.i.b16 %v483_v23, %v449_v3  ;;  %v498_v37 = vshrl.u32 %v483_v23, 16 }
 0x200   : > { %v511_v38 = vpack.i.b16 %v490_v24, %v456_v4  ;;  %v514_v40 = vshrl.u32 %v490_v24, 16  ;;  %v710_v41 = vcombine.low %v701_v28, %v709_v30  ;;  %v734_v42 = vrot.slane %v727_v32, %v2387_v25 }
 0x201   : > { %v499_v43 = vpack.i.b16 %v498_v37, %v497_v19  ;;  %v503_v44 = vpack.i.b16 %v491_v34, %v457_v13  ;;  %v506_v45 = vshrl.u32 %v491_v34, 16  ;;  %v519_v46 = vpack.i.b16 %v492_v35, %v458_v16 }
 0x202   : > { %v515_v47 = vpack.i.b16 %v514_v40, %v513_v21  ;;  %v522_v48 = vshrl.u32 %v492_v35, 16  ;;  %v525_v49 = vcombine.low %v495_v36, %v511_v38  ;;  %v717_v50 = vrot.slane %v710_v41, %v2395_v29 }
 0x203   : > { %v507_v51 = vpack.i.b16 %v506_v45, %v505_v20  ;;  %v533_v52 = vcombine.low %v503_v44, %v519_v46  ;;  %v735_v53 = vcombine.low %v726_v31, %v734_v42 }
 0x204   : > { %v523_v54 = vpack.i.b16 %v522_v48, %v521_v22  ;;  %v550_v55 = vcombine.low %v499_v43, %v515_v47  ;;  %v532_v56 = vrot.slane %v525_v49, %v2387_v25  ;;  %v747_v60 = vshrl.u32 %v717_v50, 16 }
 0x205   : > { %v540_v57 = vrot.slane %v533_v52, %v2387_v25  ;;  %v742_v58 = vrot.slane %v735_v53, %v2395_v29  ;;  %v718_v6 = vcombine.high %v717_v50, %v2104_v39 }
 0x206   : > { %v558_v59 = vcombine.low %v507_v51, %v523_v54  ;;  %v557_v2 = vrot.slane %v550_v55, %v2387_v25 }
 0x207   : > { %v541_v61 = vcombine.low %v532_v56, %v540_v57  ;;  %v746_v62 = vpack.i.b16 %v742_v58, %v717_v50  ;;  %v748_v63 = vshrl.u32 %v742_v58, 16  ;;  %v743_v1 = vcombine.high %v742_v58, %v2104_v39 }
 0x208   : > { %v565_v3 = vrot.slane %v558_v59, %v2387_v25  ;;  %v753_v14 = vshrl.u32 %v718_v6, 16 }
 0x209   : > { %v931_v4 = vsel %vm926_vm2, %v746_v62, 0  ;;  %v749_v5 = vpack.i.b16 %v748_v63, %v747_v60  ;;  %v548_v10 = vrot.slane %v541_v61, %v2395_v29  ;;  %v754_v11 = vshrl.u32 %v743_v1, 16 }
 0x20a   : > { %v566_v7 = vcombine.low %v557_v2, %v565_v3  ;;  %1710 = vmatpush3.bf16.xpose.msra.mxu0 %v931_v4  ;;  %v752_v13 = vpack.i.b16 %v743_v1, %v718_v6 }
 0x20b   : > { %v977_v9 = vsel %vm926_vm2, %v749_v5, 0  ;;  %1721 = vmatprep.subr.bf16.mxu0 %v2097_v0  ;;  %v578_v17 = vshrl.u32 %v548_v10, 16  ;;  %v755_v18 = vpack.i.b16 %v754_v11, %v753_v14  ;;  %v549_v23 = vcombine.high %v548_v10, %v2104_v39 }
 0x20c   : > { %1716 = vmatpush3.bf16.xpose.msra.mxu1 %v977_v9  ;;  %v573_v12 = vrot.slane %v566_v7, %v2395_v29  ;;  %v1023_v19 = vsel %vm926_vm2, %v752_v13, 0 }
 0x20d   : > { %1727 = vmatprep.subr.bf16.mxu1 %v2097_v0  ;;  %v1069_v22 = vsel %vm926_vm2, %v755_v18, 0  ;;  %v584_v30 = vshrl.u32 %v549_v23, 16 }
 0x20e   : > { %v579_v15 = vshrl.u32 %v573_v12, 16  ;;  %v577_v16 = vpack.i.b16 %v573_v12, %v548_v10  ;;  %v574_v21 = vcombine.high %v573_v12, %v2104_v39 }
 0x210   : > { %v580_v20 = vpack.i.b16 %v579_v15, %v578_v17  ;;  %v585_v24 = vshrl.u32 %v574_v21, 16  ;;  %v583_v28 = vpack.i.b16 %v574_v21, %v549_v23 }
 0x211   : > { %1712 = vmatmul.mubr.msk.bf16.vlgmr.msra.gmra.mrb[4].mxu0 %vm926_vm2, %v577_v16 }
 0x212   : > { %1722 = vmatpush3.bf16.xpose.msra.mxu0 %v1023_v19  ;;  %1723 = vmatprep.mubr.msk.bf16.mxu0 %vm2098_vm0, %v2097_v0  ;;  %v586_v31 = vpack.i.b16 %v585_v24, %v584_v30 }
 0x213   : > { %1718 = vmatmul.mubr.msk.bf16.vlgmr.msra.gmra.mrb[4].mxu1 %vm926_vm2, %v580_v20  ;;  %1733 = vmatprep.subr.bf16.mxu0 %v2097_v0 }
 0x214   : > { %1728 = vmatpush3.bf16.xpose.msra.mxu1 %v1069_v22  ;;  %1729 = vmatprep.mubr.msk.bf16.mxu1 %vm2098_vm0, %v2097_v0 }
 0x215   : > { %1739 = vmatprep.subr.bf16.mxu1 %v2097_v0 }
 0x219   : > { %1724 = vmatmul.mubr.msk.bf16.vlgmr.msra.gmra.mrb[8].mxu0 %vm926_vm2, %v583_v28 }
 0x21a   : > { %1735 = vmatprep.mubr.msk.bf16.mxu0 %vm2098_vm0, %v2097_v0 }
 0x21b   : > { %1730 = vmatmul.mubr.msk.bf16.vlgmr.msra.gmra.mrb[8].mxu1 %vm926_vm2, %v586_v31 }
 0x21c   : > { %1741 = vmatprep.mubr.msk.bf16.mxu1 %vm2098_vm0, %v2097_v0 }
 0x2e4   : > { %v967_v32 = vpop.f32.mrb[4].mxu0 }
 0x2e5   : > { %v1713_v34 = vpop.f32.mrb[5].mxu0  ;;  %v1111_v35 = vsel %vm926_vm2, %v967_v32, -inf }
 0x2e6   : > { %v1013_v36 = vpop.f32.mrb[4].mxu1  ;;  %1112 = vmax.xlane.f32.xlu0 %v1111_v35  ;;  %v970_v37 = vpop.f32.mrb[6].mxu0 }
 0x2e7   : > { %v1714_v38 = vpop.f32.mrb[7].mxu0  ;;  %v1719_v40 = vpop.f32.mrb[5].mxu1  ;;  %v1114_v41 = vsel %vm926_vm2, %v1013_v36, -inf }
 0x2e8   : > { %1115 = vmax.xlane.f32.xlu1 %v1114_v41  ;;  %v1016_v42 = vpop.f32.mrb[6].mxu1 }
 0x2e9   : > { %v1720_v43 = vpop.f32.mrb[7].mxu1 }
 0x2ec   : > { %v1059_v44 = vpop.f32.mrb[8].mxu0 }
 0x2ed   : > { %v1725_v45 = vpop.f32.mrb[9].mxu0  ;;  %v1117_v46 = vsel %vm926_vm2, %v1059_v44, -inf }
 0x2ee   : > { %v1105_v47 = vpop.f32.mrb[8].mxu1  ;;  %1118 = vmax.xlane.f32.xlu0 %v1117_v46  ;;  %v1062_v48 = vpop.f32.mrb[10].mxu0 }
 0x2ef   : > { %v1726_v49 = vpop.f32.mrb[11].mxu0  ;;  %v1731_v50 = vpop.f32.mrb[9].mxu1  ;;  %v1120_v53 = vsel %vm926_vm2, %v1105_v47, -inf }
 0x2f0   : > { %v1108_v51 = vpop.f32.mrb[10].mxu1 }
 0x2f1   : > { %v1732_v52 = vpop.f32.mrb[11].mxu1 }
 0x2f2   : > { %1121 = vmax.xlane.f32.xlu0 %v1120_v53 }
 0x2f9   : > { %756 = vrot.lane.b32.xlu1 %v2382_v8, %s2105_s6 }
 0x373   : > { %v1113_v54 = vpop.xlane.xlu0 %1112 }
 0x374   : > { %v1123_v55 = vsub.f32 %v967_v32, %v1113_v54 }
 0x375   : > { %v1116_v56 = vpop.xlane.xlu1 %1115 }
 0x376   : > { %v1127_v57 = vmul.f32 1.442695, %v1123_v55  ;;  %v1124_v58 = vsub.f32 %v1013_v36, %v1116_v56 }
 0x378   : > { %1863 = vpow2.f32 %v1127_v57  ;;  %v1129_v59 = vmul.f32 1.442695, %v1124_v58 }
 0x37a   : > { %1865 = vpow2.f32 %v1129_v59 }
 0x37b   : > { %v1119_v8 = vpop.xlane.xlu0 %1118 }
 0x37c   : > { %v1125_v2 = vsub.f32 %v1059_v44, %v1119_v8 }
 0x37e   : > { %v1131_v4 = vmul.f32 1.442695, %v1125_v2 }
 0x37f   : > { %v1122_v1 = vpop.xlane.xlu0 %1121 }
 0x380   : > { %v1126_v3 = vsub.f32 %v1105_v47, %v1122_v1  ;;  %1867 = vpow2.f32 %v1131_v4 }
 0x382   : > { %v2466_v60 = vpop.eup %1863  ;;  %v1133_v5 = vmul.f32 1.442695, %v1126_v3 }
 0x383   : > { %v1135_v61 = vsel %vm926_vm2, %v2466_v60, 0.0 }
 0x384   : > { %v2470_v62 = vpop.eup %1865  ;;  %1136 = vadd.xlane.f32.xlu1 %v1135_v61  ;;  %1869 = vpow2.f32 %v1133_v5 }
 0x385   : > { %v1138_v63 = vsel %vm926_vm2, %v2470_v62, 0.0 }
 0x386   : > { %1139 = vadd.xlane.f32.xlu0 %v1138_v63 }
 0x38a   : > { %v2477_v6 = vpop.eup %1867 }
 0x38b   : > { %v1141_v9 = vsel %vm926_vm2, %v2477_v6, 0.0 }
 0x38e   : > { %v2479_v7 = vpop.eup %1869 }
 0x395   : > { %760 = vrot.lane.b32.xlu1 %v2399_v33, %s2105_s6 }
 0x399   : > { %762 = vrot.lane.b32.xlu1 %v2389_v26, %s2105_s6  ;;  %v1144_v26 = vsel %vm926_vm2, %v2479_v7, 0.0 }
 0x39c   : > { %758 = vrot.lane.b32.xlu0 %v2391_v27, %s2105_s6  ;;  %v757_v27 = vpop.permute.xlu1 %756 }
 0x39d   : > { %v771_v12 = vrot.slane %v757_v27, %v2387_v25 }
 0x3bb   : > { %1142 = vadd.xlane.f32.xlu0 %v1141_v9 }
 0x3bd   : > { %1145 = vadd.xlane.f32.xlu1 %v1144_v26 }
 0x411   : > { %v1137_v33 = vpop.xlane.xlu1 %1136 }
 0x412   : > { %1871 = vrcp.f32 %v1137_v33 }
 0x413   : > { %v1140_v10 = vpop.xlane.xlu0 %1139 }
 0x414   : > { %1873 = vrcp.f32 %v1140_v10 }
 0x415   : > { %v761_v11 = vpop.permute.xlu1 %760 }
 0x416   : > { %v779_v13 = vrot.slane %v761_v11, %v2387_v25 }
 0x417   : > { %v759_v16 = vpop.permute.xlu0 %758 }
 0x418   : > { %v780_v14 = vcombine.low %v771_v12, %v779_v13  ;;  %v781_v15 = vcombine.high %v771_v12, %v779_v13  ;;  %v805_v20 = vrot.slane %v759_v16, %v2387_v25 }
 0x419   : > { %v763_v17 = vpop.permute.xlu1 %762 }
 0x41a   : > { %v788_v18 = vrot.slane %v780_v14, %v2395_v29  ;;  %v813_v19 = vrot.slane %v763_v17, %v2387_v25  ;;  %v795_v21 = vrot.slane %v781_v15, %v2395_v29 }
 0x41c   : > { %v814_v22 = vcombine.low %v805_v20, %v813_v19  ;;  %v815_v23 = vcombine.high %v805_v20, %v813_v19  ;;  %v796_v24 = vcombine.high %v788_v18, %v2104_v39  ;;  %v797_v31 = vcombine.high %v795_v21, %v2104_v39  ;;  %v1872_v58 = vpop.eup %1871 }
 0x41d   : > { %v836_v32 = vshrl.u32 %v788_v18, 16  ;;  %v852_v40 = vshrl.u32 %v795_v21, 16  ;;  %v1151_v5 = vmul.f32 %v1872_v58, %v2466_v60 }
 0x41e   : > { %v822_v28 = vrot.slane %v814_v22, %v2395_v29  ;;  %v829_v30 = vrot.slane %v815_v23, %v2395_v29  ;;  %v844_v38 = vshrl.u32 %v796_v24, 16  ;;  %v860_v47 = vshrl.u32 %v797_v31, 16  ;;  %v1874_v61 = vpop.eup %1873 }
 0x41f   : > { %v1152_v10 = vmul.f32 %v1874_v61, %v2470_v62  ;;  %v1155_v17 = vpack.c.bf16 %v1151_v5, %v1151_v5 }
 0x420   : > { %v830_v34 = vcombine.high %v822_v28, %v2104_v39  ;;  %v831_v35 = vcombine.high %v829_v30, %v2104_v39  ;;  %v834_v36 = vpack.i.b16 %v822_v28, %v788_v18  ;;  %v837_v37 = vshrl.u32 %v822_v28, 16 }
 0x421   : > { %v850_v41 = vpack.i.b16 %v829_v30, %v795_v21  ;;  %v853_v42 = vshrl.u32 %v829_v30, 16  ;;  %v1156_v18 = vpack.c.bf16 %v1152_v10, %v1152_v10 }
 0x422   : > { %v838_v43 = vpack.i.b16 %v837_v37, %v836_v32  ;;  %v842_v44 = vpack.i.b16 %v830_v34, %v796_v24  ;;  %v845_v45 = vshrl.u32 %v830_v34, 16  ;;  %v858_v46 = vpack.i.b16 %v831_v35, %v797_v31 }
 0x423   : > { %v854_v48 = vpack.i.b16 %v853_v42, %v852_v40  ;;  %v861_v49 = vshrl.u32 %v831_v35, 16  ;;  %v864_v50 = vcombine.low %v834_v36, %v850_v41 }
 0x424   : > { %v846_v51 = vpack.i.b16 %v845_v45, %v844_v38  ;;  %v872_v52 = vcombine.low %v842_v44, %v858_v46 }
 0x425   : > { %v862_v53 = vpack.i.b16 %v861_v49, %v860_v47  ;;  %v889_v54 = vcombine.low %v838_v43, %v854_v48  ;;  %v871_v55 = vrot.slane %v864_v50, %v2387_v25 }
 0x426   : > { %v879_v56 = vrot.slane %v872_v52, %v2387_v25 }
 0x427   : > { %v897_v57 = vcombine.low %v846_v51, %v862_v53  ;;  %v896_v63 = vrot.slane %v889_v54, %v2387_v25 }
 0x428   : > { %v880_v59 = vcombine.low %v871_v55, %v879_v56 }
 0x429   : > { %v904_v8 = vrot.slane %v897_v57, %v2387_v25 }
 0x42a   : > { %v887_v1 = vrot.slane %v880_v59, %v2395_v29 }
 0x42b   : > { %v905_v2 = vcombine.low %v896_v63, %v904_v8 }
 0x42c   : > { %v888_v3 = vcombine.high %v887_v1, %v2104_v39  ;;  %v917_v26 = vshrl.u32 %v887_v1, 16 }
 0x42d   : > { %v912_v4 = vrot.slane %v905_v2, %v2395_v29 }
 0x42e   : > { %v923_v11 = vshrl.u32 %v888_v3, 16 }
 0x42f   : > { %v916_v9 = vpack.i.b16 %v912_v4, %v887_v1  ;;  %v918_v27 = vshrl.u32 %v912_v4, 16  ;;  %v913_v33 = vcombine.high %v912_v4, %v2104_v39 }
 0x431   : > { %v1164_v12 = vsel %vm1162_vm3, %v916_v9, 0  ;;  %v919_v13 = vpack.i.b16 %v918_v27, %v917_v26  ;;  %v922_v14 = vpack.i.b16 %v913_v33, %v888_v3  ;;  %v924_v15 = vshrl.u32 %v913_v33, 16 }
 0x432   : > { %1734 = vmatpush3.bf16.msra.mxu0 %v1164_v12 }
 0x433   : > { %v1210_v16 = vsel %vm1162_vm3, %v919_v13, 0  ;;  %1745 = vmatprep.subr.bf16.mxu0 %v2097_v0  ;;  %v925_v60 = vpack.i.b16 %v924_v15, %v923_v11  ;;  %v1256_v39 = vsel %vm1162_vm3, %v922_v14, 0 }
 0x434   : > { %1740 = vmatpush3.bf16.msra.mxu1 %v1210_v16 }
 0x435   : > { %1736 = vmatmul.mubr.msk.bf16.vlgmr.msra.gmra.mrb[12].mxu0 %vm926_vm2, %v1155_v17  ;;  %1751 = vmatprep.subr.bf16.mxu1 %v2097_v0  ;;  %v1302_v62 = vsel %vm1162_vm3, %v925_v60, 0 }
 0x436   : > { %1746 = vmatpush3.bf16.msra.mxu0 %v1256_v39  ;;  %1747 = vmatprep.mubr.msk.bf16.mxu0 %vm2098_vm0, %v2097_v0 }
 0x437   : > { %1742 = vmatmul.mubr.msk.bf16.vlgmr.msra.gmra.mrb[12].mxu1 %vm926_vm2, %v1156_v18 }
 0x438   : > { %1752 = vmatpush3.bf16.msra.mxu1 %v1302_v62  ;;  %1753 = vmatprep.mubr.msk.bf16.mxu1 %vm2098_vm0, %v2097_v0 }
 0x448   : > { %v1143_v19 = vpop.xlane.xlu0 %1142 }
 0x449   : > { %1875 = vrcp.f32 %v1143_v19 }
 0x44a   : > { %v1146_v20 = vpop.xlane.xlu1 %1145 }
 0x44b   : > { %1877 = vrcp.f32 %v1146_v20 }
 0x453   : > { %v1876_v21 = vpop.eup %1875 }
 0x454   : > { %v1153_v22 = vmul.f32 %v1876_v21, %v2477_v6 }
 0x455   : > { %v1878_v23 = vpop.eup %1877 }
 0x456   : > { %v1154_v24 = vmul.f32 %v1878_v23, %v2479_v7  ;;  %v1157_v28 = vpack.c.bf16 %v1153_v22, %v1153_v22 }
 0x458   : > { %1748 = vmatmul.mubr.msk.bf16.vlgmr.msra.gmra.mrb[16].mxu0 %vm926_vm2, %v1157_v28  ;;  %v1158_v30 = vpack.c.bf16 %v1154_v24, %v1154_v24 }
 0x45a   : > { %1754 = vmatmul.mubr.msk.bf16.vlgmr.msra.gmra.mrb[16].mxu1 %vm926_vm2, %v1158_v30 }
 0x508   : > { %v1200_v31 = vpop.f32.mrb[12].mxu0 }
 0x509   : > { %v1737_v32 = vpop.f32.mrb[13].mxu0 }
 0x50a   : > { %v1203_v34 = vpop.f32.mrb[14].mxu0  ;;  %v1246_v0 = vpop.f32.mrb[12].mxu1 }
 0x50b   : > { %v1738_v35 = vpop.f32.mrb[15].mxu0  ;;  %v1743_v36 = vpop.f32.mrb[13].mxu1 }
 0x50c   : > { %v1249_v37 = vpop.f32.mrb[14].mxu1 }
 0x50d   : > { %v1744_v38 = vpop.f32.mrb[15].mxu1 }
 0x52b   : > { %v1292_v40 = vpop.f32.mrb[16].mxu0 }
 0x52c   : > { %v1344_v41 = vcombine.low %v1200_v31, %v1292_v40  ;;  %v1345_v6 = vcombine.high %v1200_v31, %v1292_v40  ;;  %v1749_v42 = vpop.f32.mrb[17].mxu0 }
 0x52d   : > { %v1295_v43 = vpop.f32.mrb[18].mxu0  ;;  %v1338_v7 = vpop.f32.mrb[16].mxu1 }
 0x52e   : > { %v1360_v44 = vcombine.low %v1246_v0, %v1338_v7  ;;  %v1361_v45 = vcombine.high %v1246_v0, %v1338_v7  ;;  %v1750_v46 = vpop.f32.mrb[19].mxu0  ;;  %v1755_v47 = vpop.f32.mrb[17].mxu1  ;;  %v1352_v49 = vrot.slane %v1344_v41, %v2387_v25  ;;  %v1359_v50 = vrot.slane %v1345_v6, %v2387_v25 }
 0x52f   : > { %v1341_v48 = vpop.f32.mrb[18].mxu1 }
 0x530   : > { %v1368_v51 = vrot.slane %v1360_v44, %v2387_v25  ;;  %v1375_v52 = vrot.slane %v1361_v45, %v2387_v25  ;;  %v1756_v53 = vpop.f32.mrb[19].mxu1 }
 0x532   : > { %v1376_v54 = vcombine.low %v1352_v49, %v1368_v51  ;;  %v1377_v55 = vcombine.high %v1352_v49, %v1368_v51  ;;  %v1392_v56 = vcombine.low %v1359_v50, %v1375_v52  ;;  %v1393_v57 = vcombine.high %v1359_v50, %v1375_v52 }
 0x534   : > { %v1384_v58 = vrot.slane %v1376_v54, %v2395_v29  ;;  %v1391_v59 = vrot.slane %v1377_v55, %v2395_v29  ;;  %v1400_v61 = vrot.slane %v1392_v56, %v2395_v29  ;;  %v1407_v63 = vrot.slane %v1393_v57, %v2395_v29 }
 0x536   : > { %v1412_v8 = vcombine.low %v1384_v58, %v1391_v59  ;;  %v1665_v1 = vcombine.high %v1384_v58, %v1391_v59  ;;  %v1428_v2 = vcombine.low %v1400_v61, %v1407_v63  ;;  %v1666_v3 = vcombine.high %v1400_v61, %v1407_v63 }
 0x538   : > { %v1419_v4 = vrot.slane %v1412_v8, %v2387_v25  ;;  %v1427_v5 = vrot.slane %v1665_v1, %v2387_v25  ;;  %v1435_v9 = vrot.slane %v1428_v2, %v2387_v25  ;;  %v1443_v26 = vrot.slane %v1666_v3, %v2387_v25 }
 0x53a   : > { %v1445_v27 = vcombine.high %v1419_v4, %v1427_v5  ;;  %v1461_v33 = vcombine.high %v1435_v9, %v1443_v26  ;;  %v1444_v10 = vcombine.low %v1419_v4, %v1427_v5  ;;  %v1460_v11 = vcombine.low %v1435_v9, %v1443_v26 }
 0x53c   : > { %v1459_v12 = vrot.slane %v1445_v27, %v2395_v29  ;;  %v1475_v13 = vrot.slane %v1461_v33, %v2395_v29  ;;  %v1452_v14 = vrot.slane %v1444_v10, %v2395_v29  ;;  %v1468_v15 = vrot.slane %v1460_v11, %v2395_v29 }
 0x53e   : > { %v1478_v16 = vcombine.low %v1459_v12, %v1475_v13  ;;  %v1477_v17 = vcombine.high %v1452_v14, %v1468_v15  ;;  %v1479_v60 = vcombine.high %v1459_v12, %v1475_v13  ;;  %v1476_v39 = vcombine.low %v1452_v14, %v1468_v15 }
 0x540   : > { %1485 = vrot.lane.b32.xlu1 %v1478_v16, %s2106_s5  ;;  %1481 = vrot.lane.b32.xlu0 %v1477_v17, %s2107_s13 }
 0x544   : > { %1489 = vrot.lane.b32.xlu0 %v1479_v60, %s2108_s11 }
 0x5b2   : > { %v1482_v25 = vpop.permute.xlu0 %1481  ;;  %v1486_v18 = vpop.permute.xlu1 %1485 }
 0x5b3   : > { %v1492_v62 = vsel %vm926_vm2, %v1476_v39, %v1482_v25 }
 0x5b4   : > { %v1494_v19 = vsel %vm1493_vm4, %v1492_v62, %v1486_v18 }
 0x5b6   : > { %v1490_v29 = vpop.permute.xlu0 %1489 }
 0x5b7   : > { %v1496_v20 = vsel %vm1495_vm5, %v1494_v19, %v1490_v29 }
 0x5b8   : > { %1497 = vst.msk [vmem:[%s295_s8] sm:$0xff] %vm314_vm1, %v1496_v20 }
 0x5b9   : > { %2008 = shalt.err (!%p2005_p7)
}
 0x5ba   : > { %s2009_s2 = scalar_lea.hbm %s2545_s7, 128  ;;  %s2013_s12 = scalar_lea.hbm %s2599_s4, 256 }
 0x5bb   : > { %p2010_p13 = scmp.ne.s32.totalorder %s2545_s7, %s2009_s2  ;;  %p2014_p11 = scmp.lt.u32.totalorder %s2545_s7, %s2599_s4 }
 0x5bc   : > { %p2015_p12 = scmp.lt.u32.totalorder %s2013_s12, %s2009_s2  ;;  %p2017_p1 = scmp.lt.u32.totalorder %s2009_s2, %s2545_s7 }
 0x5bd   : > { %p2011_p2 = pnand %p2010_p13, %p2623_p6 }
 0x5be   : > { %p2016_p0 = por %p2015_p12, %p2014_p11 }
 0x5bf   : > { %p2012_p8 = pneg %p2011_p2 }
 0x5c0   : > { %p2018_p10 = por %p2017_p1, %p2016_p0 }
 0x5c2   : > { %p2019_p3 = pnand %p2018_p10, %p2012_p8 }
 0x5c4   : > { %2022 = shalt.err (!%p2019_p3)
}
 0x5c5   : > { %1769 = dma.vmem_to_hbm [thread:$0]  (%p2623_p6), %s2547_s10, 128, %s2545_s7, %s1499_s9  }
 0x5c6 PF: > { %s1525_s13 = sand.u32 1, %s2069_s15   ;;  %p2624_p4 = scmp.ne.s32.totalorder %s2608_s24, 0 }
 0x5c7   : > { %p2625_p9 = scmp.ge.s32.totalorder %s2089_s20, 2  ;;  %s1526_s11 = scalar_lea.sflag [#allocation4], %s1525_s13 }
 0x5c9   : > { %p1786_p5 = pnand %p2625_p9, %p2624_p4 }
 0x5cb   : > { %2064 = dma.done.wait (!%p1786_p5), %s1526_s11, 128  }
 0x5cc   : > { %2066 = vsyncadd (!%p1786_p5), %s1526_s11, 4294967168  ;;  %s24_s20 = sadd.s32 1, %s2089_s20   ;;  %s2626_s28 = sld [smem:[#allocation16_spill]] }
 0x5cd   : > { %p21_p7 = scmp.ge.s32.totalorder %s24_s20, 4   ;;  %s2627_s15 = smov %s2073_s16 }
 0x5ce   : > { %s2628_s16 = smov %s2077_s17  ;;  %s2629_s17 = smov %s2275_s14 }
 0x5cf   : > { %s2630_s18 = smov %s2085_s19  ;;  %23 = sbr.rel (!%p21_p7) target bundleno = 12 (0xc), region = 102 }
 0x5d2   : > { %s2631_s19 = smov %s2626_s28 }
 0x5d6   :  { %1531 = vsyncpa [#allocation3], 1 }
 0x5d7   :  { %1533 = vsyncpa [#allocation3 + $0x1], 1 }
 0x5d8   :  { %1534 = vsyncpa [#allocation6], 1 }
 0x5d9   :  { %1536 = vsyncpa [#allocation6 + $0x1], 1 }
 0x5da   :  { %1537 = vsyncpa [#allocation9], 1 }
 0x5db   :  { %1538 = vsyncpa [#allocation4], 1 }
 0x5dc   :  { %1540 = vsyncpa [#allocation4 + $0x1], 1 }

</bundles_post_ra>
